<compile_context>
chip_gen: v5e
topology: v5e:2x2
jax: 0.10.0
libtpu: 0.0.40
codegen_flags: <defaults>
</compile_context>

<pallas_src>
import math

import jax
import jax.numpy as jnp
from jax import lax
from jax.experimental import pallas as pl
from jax.experimental.pallas import tpu as pltpu


def _round_up(x: int, m: int) -> int:
    return (x + m - 1) // m * m


def _pick_tile(dim_padded: int, cap: int = 512) -> int:
    """Largest multiple of 128 that divides dim_padded and is <= cap."""
    best = 128
    t = 128
    while t <= min(cap, dim_padded):
        if dim_padded % t == 0:
            best = t
        t += 128
    return best


def _pad2(a, rows: int, cols: int):
    pr, pc = rows - a.shape[0], cols - a.shape[1]
    if pr == 0 and pc == 0:
        return a
    return jnp.pad(a, ((0, pr), (0, pc)))


def _pad1(a, n: int):
    p = n - a.shape[0]
    if p == 0:
        return a
    return jnp.pad(a, (0, p))


# ---------------------------------------------------------------------------
# Kernels.  Grid = (i: batch, j: out, k: in reduction); k is innermost.
# The output block index is k-invariant, so it stays VMEM-resident across k.
# ---------------------------------------------------------------------------
def _noisy_linear_kernel_f32out(x_ref, wmu_ref, wsig_ref, eout_ref, ein_ref,
                                beff_ref, o_ref):
    """f32 output: accumulate directly into o_ref (no scratch)."""
    k = pl.program_id(2)

    @pl.when(k == 0)
    def _():
        # Seed the accumulator with the (already fused) bias.
        o_ref[...] = jnp.broadcast_to(beff_ref[...], o_ref.shape).astype(o_ref.dtype)

    # Rebuild the factorized weight noise for this (out, in) block on the VPU
    # in f32 (v5e VPU has no bf16):  weight_epsilon[j, k] = eps_out[j] * eps_in[k]
    w_eps = eout_ref[...] * ein_ref[...]                              # (tn, tk) f32
    w_eff = wmu_ref[...].astype(jnp.float32) + \
        wsig_ref[...].astype(jnp.float32) * w_eps                     # (tn, tk) f32

    x_blk = x_ref[...]                                                # (tm, tk)
    # Contract the last (in) dim of both operands -> (tm, tn); equivalent to
    # x @ w_eff.T without materializing a transpose.
    o_ref[...] += lax.dot_general(
        x_blk, w_eff.astype(x_blk.dtype),
        dimension_numbers=(((1,), (1,)), ((), ())),
        preferred_element_type=jnp.float32)


def _noisy_linear_kernel_scratch(x_ref, wmu_ref, wsig_ref, eout_ref, ein_ref,
                                 beff_ref, o_ref, acc_ref):
    """Non-f32 output: f32 VMEM accumulator + finalize cast."""
    k = pl.program_id(2)

    @pl.when(k == 0)
    def _():
        acc_ref[...] = jnp.broadcast_to(beff_ref[...], acc_ref.shape).astype(jnp.float32)

    w_eps = eout_ref[...] * ein_ref[...]
    w_eff = wmu_ref[...].astype(jnp.float32) + \
        wsig_ref[...].astype(jnp.float32) * w_eps

    x_blk = x_ref[...]
    acc_ref[...] += lax.dot_general(
        x_blk, w_eff.astype(x_blk.dtype),
        dimension_numbers=(((1,), (1,)), ((), ())),
        preferred_element_type=jnp.float32)

    @pl.when(k == pl.num_programs(2) - 1)
    def _():
        o_ref[...] = acc_ref[...].astype(o_ref.dtype)


# ---------------------------------------------------------------------------
# Wrapper.
# ---------------------------------------------------------------------------
def noisy_linear(x, weight_mu, weight_sigma, bias_mu, bias_sigma,
                 eps_in, eps_out, *, compute_dtype=jnp.bfloat16):
    """NoisyLinear forward.

    x:               (..., in_features)
    weight_mu/sigma: (out_features, in_features)   (PyTorch layout)
    bias_mu/sigma:   (out_features,)
    eps_in:          (in_features,)   factorized noise (weight_eps = outer(eps_out, eps_in))
    eps_out:         (out_features,)  (also equals bias_epsilon)
    compute_dtype:   dtype of the HBM weight/x streams and of the MXU operands
                     (default bf16: native MXU path on v6e/v7x, halves HBM
                     traffic everywhere).  Accumulation is always f32.  Pass
                     jnp.float32 for bit-accurate results.
    """
    orig_dtype = jnp.dtype(x.dtype)
    lead = x.shape[:-1]
    in_f = x.shape[-1]
    out_f = weight_mu.shape[0]

    x2 = x.reshape(-1, in_f)
    B = x2.shape[0]

    # Padded feature dims: only up to the next lane multiple (128); the tiles
    # below are chosen to divide these exactly (no tile-driven over-padding).
    Kp = _round_up(in_f, 128)
    Np = _round_up(out_f, 128)

    # Batch tile: cover the whole batch when it fits (weights then stream
    # through HBM and the noise fusion runs exactly once per weight block).
    if B <= 512:
        tm = _round_up(B, 8)
        Bp = tm
    else:
        tm = 512
        Bp = _round_up(B, 512)

    tk = _pick_tile(Kp, 512)
    tn = _pick_tile(Np, 512)
    # Keep >= 2 blocks on the parallel (i, j) axes so both v7x TensorCores get
    # work; the only cost elsewhere is one extra (small) x re-read.
    if (Bp // tm) * (Np // tn) < 2 and Np >= 256:
        tn = Np // 2 if (Np // 2) % 128 == 0 else 128

    w_dtype = jnp.dtype(compute_dtype)

    # NOTE: in a real layer keep weight_mu/weight_sigma stored pre-cast and
    # pre-padded to 128 multiples so the casts/pads below are no-ops per call.
    x2 = _pad2(x2.astype(compute_dtype), Bp, Kp)
    wmu = _pad2(weight_mu.astype(w_dtype), Np, Kp)
    wsig = _pad2(weight_sigma.astype(w_dtype), Np, Kp)
    eout_col = _pad1(eps_out.astype(jnp.float32), Np).reshape(Np, 1)
    ein_row = _pad1(eps_in.astype(jnp.float32), Kp).reshape(1, Kp)
    # Effective bias is O(out): fuse it here, pass a single (1, Np) stream.
    beff = _pad1((bias_mu + bias_sigma * eps_out).astype(jnp.float32), Np).reshape(1, Np)

    grid = (Bp // tm, Np // tn, Kp // tk)

    acc_in_out = orig_dtype == jnp.dtype(jnp.float32)
    kernel = _noisy_linear_kernel_f32out if acc_in_out else _noisy_linear_kernel_scratch
    scratch = [] if acc_in_out else [pltpu.VMEM((tm, tn), jnp.float32)]

    # Explicit VMEM budget (double-buffered streams + f32 w_eps/w_eff temps);
    # keeps enlarged tiles honest on v7x (64 MiB physical / 32 MiB scoped).
    xb = jnp.dtype(compute_dtype).itemsize
    ob = orig_dtype.itemsize
    vmem_est = (2 * tm * tk * xb                     # x (double-buffered)
                + 2 * 2 * tn * tk * w_dtype.itemsize  # wmu + wsig
                + 2 * (tn + tk + tn) * 4              # eps_out, eps_in, bias
                + 2 * tm * tn * ob                    # output
                + (0 if acc_in_out else tm * tn * 4)  # acc scratch
                + 3 * tn * tk * 4)                    # w_eps / w_eff f32 temporaries
    vmem_limit = min(max(2 * vmem_est, 32 << 20), 64 << 20)

    out = pl.pallas_call(
        kernel,
        out_shape=jax.ShapeDtypeStruct((Bp, Np), orig_dtype),
        grid_spec=pltpu.PrefetchScalarGridSpec(
            num_scalar_prefetch=0,
            grid=grid,
            in_specs=[
                pl.BlockSpec((tm, tk), lambda i, j, k: (i, k)),   # x
                pl.BlockSpec((tn, tk), lambda i, j, k: (j, k)),   # weight_mu
                pl.BlockSpec((tn, tk), lambda i, j, k: (j, k)),   # weight_sigma
                pl.BlockSpec((tn, 1), lambda i, j, k: (j, 0)),    # eps_out (column)
                pl.BlockSpec((1, tk), lambda i, j, k: (0, k)),    # eps_in (row)
                pl.BlockSpec((1, tn), lambda i, j, k: (0, j)),    # fused bias
            ],
            out_specs=pl.BlockSpec((tm, tn), lambda i, j, k: (i, j)),
            scratch_shapes=scratch,
        ),
        compiler_params=pltpu.CompilerParams(
            dimension_semantics=("parallel", "parallel", "arbitrary"),
            vmem_limit_bytes=int(vmem_limit)),
    )(x2, wmu, wsig, eout_col, ein_row, beff)

    out = out[:B, :out_f]
    return out.reshape(*lead, out_f)


# ---------------------------------------------------------------------------
# Deterministic parameter / noise construction (mirrors __init__ + reset_*).
# Noise is kept factorized (eps_in, eps_out); weight_epsilon = outer(eps_out, eps_in).
# ---------------------------------------------------------------------------
def init_noisy_linear_params(key, in_features, out_features, std_init=0.5,
                             dtype=jnp.float32):
    k_wmu, k_bmu, k_ein, k_eout = jax.random.split(key, 4)
    mu_range = 1.0 / math.sqrt(in_features)

    weight_mu = jax.random.uniform(
        k_wmu, (out_features, in_features), dtype, -mu_range, mu_range)
    weight_sigma = jnp.full((out_features, in_features),
                            std_init / math.sqrt(in_features), dtype)
    bias_mu = jax.random.uniform(
        k_bmu, (out_features,), dtype, -mu_range, mu_range)
    bias_sigma = jnp.full((out_features,),
                          std_init / math.sqrt(out_features), dtype)

    def scale_noise(k, size):
        v = jax.random.normal(k, (size,), dtype)
        return jnp.sign(v) * jnp.sqrt(jnp.abs(v))

    eps_in = scale_noise(k_ein, in_features)
    eps_out = scale_noise(k_eout, out_features)

    return dict(weight_mu=weight_mu, weight_sigma=weight_sigma,
                bias_mu=bias_mu, bias_sigma=bias_sigma,
                eps_in=eps_in, eps_out=eps_out)


if __name__ == "__main__":
    key = jax.random.PRNGKey(0)

    def run_case(case_key, batch, in_features, out_features, *,
                 x_dtype=jnp.float32, compute_dtype=jnp.bfloat16,
                 atol=5e-2, rtol=5e-2):
        k_params, k_x = jax.random.split(case_key)
        p = init_noisy_linear_params(k_params, in_features, out_features)
        x = jax.random.normal(k_x, (batch, in_features), jnp.float32).astype(x_dtype)

        y = noisy_linear(x, p["weight_mu"], p["weight_sigma"],
                         p["bias_mu"], p["bias_sigma"],
                         p["eps_in"], p["eps_out"],
                         compute_dtype=compute_dtype)
        y = jax.block_until_ready(y)

        # Pure-JAX reference with the materialized epsilon (same math as torch
        # F.linear with noisy params), in full f32.
        w_eps = jnp.outer(p["eps_out"], p["eps_in"])
        w_eff = p["weight_mu"] + p["weight_sigma"] * w_eps
        b_eff = p["bias_mu"] + p["bias_sigma"] * p["eps_out"]
        y_ref = x.astype(jnp.float32) @ w_eff.T + b_eff

        assert y.shape == (batch, out_features)
        assert y.dtype == jnp.dtype(x_dtype)
        y_f32 = y.astype(jnp.float32)
        err = float(jnp.max(jnp.abs(y_f32 - y_ref)))
        assert jnp.allclose(y_f32, y_ref, atol=atol, rtol=rtol), f"max abs err {err}"

    k1, k2, k3, k4 = jax.random.split(key, 4)
    # Exact f32 path (accumulate-into-output kernel), tiny unaligned shape.
    run_case(k1, batch=8, in_features=32, out_features=64,
             compute_dtype=jnp.float32, atol=1e-4, rtol=1e-4)
    # Default bf16 path, 384-dim features: tiles divide 384 exactly (no
    # over-padding), multi-block j grid (tolerances loosened for bf16).
    run_case(k2, batch=16, in_features=384, out_features=384)
    # Multi-block k reduction (in=640 -> tk=128, 5 k-steps) + split j.
    run_case(k3, batch=24, in_features=640, out_features=256)
    # bf16 input/output -> f32 accumulator scratch + finalize-cast kernel.
    run_case(k4, batch=8, in_features=128, out_features=128,
             x_dtype=jnp.bfloat16)

    print("KERNEL_OK")
</pallas_src>

<mosaic_0001>
module attributes {stable_mosaic.version = 11 : i64} {
  func.func @_noisy_linear_kernel_f32out(%arg0: i32, %arg1: i32, %arg2: i32, %arg3: memref<8x128xf32, #tpu.memory_space<vmem>>, %arg4: memref<128x128xf32, #tpu.memory_space<vmem>>, %arg5: memref<128x128xf32, #tpu.memory_space<vmem>>, %arg6: memref<128x1xf32, #tpu.memory_space<vmem>>, %arg7: memref<1x128xf32, #tpu.memory_space<vmem>>, %arg8: memref<1x128xf32, #tpu.memory_space<vmem>>, %arg9: memref<8x128xf32, #tpu.memory_space<vmem>>) attributes {dimension_semantics = [#tpu.dimension_semantics<parallel>, #tpu.dimension_semantics<parallel>, #tpu.dimension_semantics<arbitrary>], iteration_bounds = array<i64: 1, 1, 1>, scalar_prefetch = 0 : i64, scratch_operands = 0 : i64, tpu.core_type = #tpu.core_type<tc>, window_params = [{transform_indices = @transform_0, window_bounds = array<i64: 8, 128>}, {transform_indices = @transform_1, window_bounds = array<i64: 128, 128>}, {transform_indices = @transform_2, window_bounds = array<i64: 128, 128>}, {transform_indices = @transform_3, window_bounds = array<i64: 128, 1>}, {transform_indices = @transform_4, window_bounds = array<i64: 1, 128>}, {transform_indices = @transform_5, window_bounds = array<i64: 1, 128>}, {transform_indices = @transform_6, window_bounds = array<i64: 8, 128>}]} {
    %c0_i32 = arith.constant 0 : i32
    %0 = arith.cmpi eq, %arg2, %c0_i32 : i32
    %1 = arith.extui %0 : i1 to i32
    %c0_i32_0 = arith.constant 0 : i32
    %2 = arith.cmpi ne, %1, %c0_i32_0 : i32
    scf.if %2 {
      %c0_14 = arith.constant 0 : index
      %c0_15 = arith.constant 0 : index
      %17 = vector.load %arg8[%c0_14, %c0_15] : memref<1x128xf32, #tpu.memory_space<vmem>>, vector<1x128xf32>
      %18 = vector.shape_cast %17 : vector<1x128xf32> to vector<1x128xf32>
      %19 = vector.broadcast %18 : vector<1x128xf32> to vector<8x128xf32>
      %c0_16 = arith.constant 0 : index
      %c0_17 = arith.constant 0 : index
      %20 = vector.load %arg9[%c0_16, %c0_17] : memref<8x128xf32, #tpu.memory_space<vmem>>, vector<8x128xf32>
      tpu.vector_store %arg9[%c0_16, %c0_17], %19 {strides = array<i32>} : memref<8x128xf32, #tpu.memory_space<vmem>>, vector<8x128xf32>,
    } else {
    }
    %c0 = arith.constant 0 : index
    %c0_1 = arith.constant 0 : index
    %3 = vector.load %arg6[%c0, %c0_1] : memref<128x1xf32, #tpu.memory_space<vmem>>, vector<128x1xf32>
    %c0_2 = arith.constant 0 : index
    %c0_3 = arith.constant 0 : index
    %4 = vector.load %arg7[%c0_2, %c0_3] : memref<1x128xf32, #tpu.memory_space<vmem>>, vector<1x128xf32>
    %5 = vector.broadcast %3 : vector<128x1xf32> to vector<128x128xf32>
    %6 = vector.broadcast %4 : vector<1x128xf32> to vector<128x128xf32>
    %7 = arith.mulf %5, %6 : vector<128x128xf32>
    %c0_4 = arith.constant 0 : index
    %c0_5 = arith.constant 0 : index
    %8 = vector.load %arg4[%c0_4, %c0_5] : memref<128x128xf32, #tpu.memory_space<vmem>>, vector<128x128xf32>
    %c0_6 = arith.constant 0 : index
    %c0_7 = arith.constant 0 : index
    %9 = vector.load %arg5[%c0_6, %c0_7] : memref<128x128xf32, #tpu.memory_space<vmem>>, vector<128x128xf32>
    %10 = arith.mulf %9, %7 : vector<128x128xf32>
    %11 = arith.addf %8, %10 : vector<128x128xf32>
    %c0_8 = arith.constant 0 : index
    %c0_9 = arith.constant 0 : index
    %12 = vector.load %arg3[%c0_8, %c0_9] : memref<8x128xf32, #tpu.memory_space<vmem>>, vector<8x128xf32>
    %c0_10 = arith.constant 0 : index
    %c0_11 = arith.constant 0 : index
    %13 = vector.load %arg9[%c0_10, %c0_11] : memref<8x128xf32, #tpu.memory_space<vmem>>, vector<8x128xf32>
    %cst = arith.constant dense<0.000000e+00> : vector<8x128xf32>
    %14 = tpu.matmul %12, %11, %cst {dimension_numbers = #tpu.dot_dimension_numbers<[1], [1], [0], [0], [0, 0, 1, 0], [], []>} : vector<8x128xf32>, vector<128x128xf32>, vector<8x128xf32> -> vector<8x128xf32>
    %15 = arith.addf %13, %14 : vector<8x128xf32>
    %c0_12 = arith.constant 0 : index
    %c0_13 = arith.constant 0 : index
    %16 = vector.load %arg9[%c0_12, %c0_13] : memref<8x128xf32, #tpu.memory_space<vmem>>, vector<8x128xf32>
    tpu.vector_store %arg9[%c0_12, %c0_13], %15 {strides = array<i32>} : memref<8x128xf32, #tpu.memory_space<vmem>>, vector<8x128xf32>,
    return
  }
  func.func @transform_0(%arg0: i32, %arg1: i32, %arg2: i32) -> (i32, i32) {
    %c0_i32 = arith.constant 0 : i32
    return %arg0, %arg2 : i32, i32
  }
  func.func @transform_1(%arg0: i32, %arg1: i32, %arg2: i32) -> (i32, i32) {
    %c0_i32 = arith.constant 0 : i32
    return %arg1, %arg2 : i32, i32
  }
  func.func @transform_2(%arg0: i32, %arg1: i32, %arg2: i32) -> (i32, i32) {
    %c0_i32 = arith.constant 0 : i32
    return %arg1, %arg2 : i32, i32
  }
  func.func @transform_3(%arg0: i32, %arg1: i32, %arg2: i32) -> (i32, i32) {
    %c0_i32 = arith.constant 0 : i32
    %c0_i32_0 = arith.constant 0 : i32
    return %arg1, %c0_i32 : i32, i32
  }
  func.func @transform_4(%arg0: i32, %arg1: i32, %arg2: i32) -> (i32, i32) {
    %c0_i32 = arith.constant 0 : i32
    %c0_i32_0 = arith.constant 0 : i32
    return %c0_i32, %arg2 : i32, i32
  }
  func.func @transform_5(%arg0: i32, %arg1: i32, %arg2: i32) -> (i32, i32) {
    %c0_i32 = arith.constant 0 : i32
    %c0_i32_0 = arith.constant 0 : i32
    return %c0_i32, %arg1 : i32, i32
  }
  func.func @transform_6(%arg0: i32, %arg1: i32, %arg2: i32) -> (i32, i32) {
    %c0_i32 = arith.constant 0 : i32
    return %arg0, %arg1 : i32, i32
  }
}

</mosaic_0001>

<bundles_post_ra>
// kernel: tpu_custom_call.1
= control target key start
LH: loop header
LB: loop body
LE: loop exit
PB: predicated region body
PF: predicated region fallthrough
CT: control target
= control target key end

     0   :  { %11 = vsyncpa [#allocation3], 0  ;;  %s544_s0 = inlined_call_operand.hbm [shape: f32[8,128], index: 0, kind: input, shape index: {}]   ;;  %s545_s1 = inlined_call_operand.vmem [shape: f32[128,128], index: 1, kind: input, shape index: {}]   ;;  %s546_s2 = inlined_call_operand.hbm [shape: f32[128,128], index: 2, kind: input, shape index: {}]   ;;  %s547_s3 = inlined_call_operand.vmem [shape: f32[128,1], index: 3, kind: input, shape index: {}]   ;;  %s548_s4 = inlined_call_operand.vmem [shape: f32[1,128], index: 4, kind: input, shape index: {}]   ;;  %s549_s5 = inlined_call_operand.vmem [shape: f32[1,128], index: 5, kind: input, shape index: {}]   ;;  %s550_s6 = inlined_call_operand.hbm [shape: f32[8,128], index: 6, kind: output, shape index: {}]  }
   0x1   :  { %12 = vsyncpa [#allocation6], 0 }
   0x2   :  { %13 = vsyncpa [#allocation4], 0  ;;  %s19_s23 = sshll.u32 %s544_s0, 4  ;;  %s374_s24 = smov [#allocation2]   ;;  %s20_s23 = int_to_ptr.hbm [resolvable:$true] %s19_s23 }
   0x3   :  { %s21_s25 = sshll.u32 %s374_s24, 4  ;;  %s31_s28 = sshll.u32 %s546_s2, 4  ;;  %s22_s25 = int_to_ptr.vmem [resolvable:$true] %s21_s25  ;;  %s32_s28 = int_to_ptr.hbm [resolvable:$true] %s31_s28 }
   0x4   :  { %24 = dma.hbm_to_vmem [thread:$0]  %s20_s23, 128, %s22_s25, [#allocation3]  }
   0x5   :  { %s375_s29 = smov [#allocation5]   ;;  %s376_s7 = smov 128  }
   0x6   :  { %s33_s30 = sshll.u32 %s375_s29, 4  ;;  %s377_s8 = smov 8   ;;  %s34_s30 = int_to_ptr.vmem [resolvable:$true] %s33_s30 }
   0x7   :  { %39 = dma.hbm_to_vmem [thread:$0]  %s32_s28, 2048, %s34_s30, [#allocation6], %s376_s7, %s376_s7, %s377_s8  }
   0x8   :  { %368 = dma.done.wait [#allocation3], 128  }
   0x9   :  { %369 = vsyncadd [#allocation3], 4294967168 }
   0xa   :  { %370 = dma.done.wait [#allocation6], 2048  }
   0xb   :  { %371 = vsyncadd [#allocation6], 4294965248  ;;  %v378_v0 = vmov 0   ;;  %v78_v1 = vld [vmem:[%s547_s3 + $0x78] sm:$0xff]  ;;  %v76_v2 = vld [vmem:[%s547_s3 + $0x68] sm:$0xff]  ;;  %s379_s19 = smov [#allocation7]  }
   0xc   :  { %292 = vset.pattern.permute.xlu1 %v378_v0  ;;  %291 = vset.pattern.permute.xlu0 %v378_v0  ;;  %v74_v3 = vld [vmem:[%s547_s3 + $0x58] sm:$0xff]  ;;  %v77_v4 = vld [vmem:[%s547_s3 + $0x70] sm:$0xff]  ;;  %v75_v5 = vld [vmem:[%s547_s3 + $0x60] sm:$0xff]  ;;  %s272_s20 = sshll.u32 %s379_s19, 4  ;;  %s274_s23 = sshll.u32 %s550_s6, 4  ;;  %s273_s20 = int_to_ptr.vmem [resolvable:$true] %s272_s20  ;;  %s275_s23 = int_to_ptr.hbm [resolvable:$true] %s274_s23 }
   0xd   :  { %293 = vset.pattern.permute.xlu2 %v378_v0  ;;  %157 = vperm.xlu0 %291, %v78_v1   ;;  %v73_v6 = vld [vmem:[%s547_s3 + $0x50] sm:$0xff]  ;;  %v72_v7 = vld [vmem:[%s547_s3 + $0x48] sm:$0xff]  ;;  %v71_v8 = vld [vmem:[%s547_s3 + $0x40] sm:$0xff] }
   0xe   :  { %147 = vperm.xlu1 %292, %v76_v2   ;;  %137 = vperm.xlu2 %293, %v74_v3   ;;  %v70_v9 = vld [vmem:[%s547_s3 + $0x38] sm:$0xff]  ;;  %v69_v10 = vld [vmem:[%s547_s3 + $0x30] sm:$0xff]  ;;  %v68_v11 = vld [vmem:[%s547_s3 + $0x28] sm:$0xff] }
   0xf   :  { %v67_v12 = vld [vmem:[%s547_s3 + $0x20] sm:$0xff]  ;;  %v66_v13 = vld [vmem:[%s547_s3 + $0x18] sm:$0xff]  ;;  %v65_v14 = vld [vmem:[%s547_s3 + $0x10] sm:$0xff] }
  0x10   :  { %v64_v15 = vld [vmem:[%s547_s3 + $0x8] sm:$0xff]  ;;  %v63_v16 = vld [vmem:[%s547_s3] sm:$0xff]  ;;  %v194_v22 = vld [vmem:[%s545_s1 + $0x78] sm:$0xff] }
  0x11   :  { %v472_v17 = vld [vmem:[%s548_s4] ss:$0 sm:$0xff]  ;;  %v209_v25 = vld [vmem:[#allocation5 + $0x70] sm:$0xff]  ;;  %v208_v30 = vld [vmem:[#allocation5 + $0x68] sm:$0xff] }
  0x12   :  { %v210_v20 = vld [vmem:[#allocation5 + $0x78] sm:$0xff]  ;;  %v193_v32 = vld [vmem:[%s545_s1 + $0x70] sm:$0xff]  ;;  %v207_v37 = vld [vmem:[#allocation5 + $0x60] sm:$0xff] }
  0x13   :  { %v192_v38 = vld [vmem:[%s545_s1 + $0x68] sm:$0xff]  ;;  %v206_v42 = vld [vmem:[#allocation5 + $0x58] sm:$0xff]  ;;  %v205_v48 = vld [vmem:[#allocation5 + $0x50] sm:$0xff] }
  0x14   :  { %v191_v43 = vld [vmem:[%s545_s1 + $0x60] sm:$0xff]  ;;  %v190_v50 = vld [vmem:[%s545_s1 + $0x58] sm:$0xff]  ;;  %v204_v54 = vld [vmem:[#allocation5 + $0x48] sm:$0xff] }
  0x15   :  { %152 = vperm.xlu0 %291, %v77_v4   ;;  %v189_v56 = vld [vmem:[%s545_s1 + $0x50] sm:$0xff]  ;;  %v203_v60 = vld [vmem:[#allocation5 + $0x40] sm:$0xff]  ;;  %v202_v2 = vld [vmem:[#allocation5 + $0x38] sm:$0xff] }
  0x16   :  { %142 = vperm.xlu1 %292, %v75_v5   ;;  %132 = vperm.xlu2 %293, %v73_v6   ;;  %v188_v61 = vld [vmem:[%s545_s1 + $0x48] sm:$0xff]  ;;  %v187_v4 = vld [vmem:[%s545_s1 + $0x40] sm:$0xff] }
  0x1d   :  { %127 = vperm.xlu0 %291, %v72_v7  }
  0x1e   :  { %122 = vperm.xlu1 %292, %v71_v8   ;;  %117 = vperm.xlu2 %293, %v70_v9   ;;  %v201_v8 = vld [vmem:[#allocation5 + $0x30] sm:$0xff] }
  0x25   :  { %112 = vperm.xlu0 %291, %v69_v10   ;;  %v186_v10 = vld [vmem:[%s545_s1 + $0x38] sm:$0xff] }
  0x26   :  { %107 = vperm.xlu1 %292, %v68_v11   ;;  %102 = vperm.xlu2 %293, %v67_v12  }
  0x2d   :  { %97 = vperm.xlu0 %291, %v66_v13  }
  0x2e   :  { %92 = vperm.xlu1 %292, %v65_v14   ;;  %87 = vperm.xlu2 %293, %v64_v15   ;;  %v200_v14 = vld [vmem:[#allocation5 + $0x28] sm:$0xff] }
  0x2f   :  { %v185_v15 = vld [vmem:[%s545_s1 + $0x30] sm:$0xff] }
  0x35   :  { %82 = vperm.xlu0 %291, %v63_v16  }
  0x68   :  { %v138_v29 = vpop.permute.xlu2 %137 }
  0x69   :  { %v174_v39 = vmul.f32 %v472_v17, %v138_v29  ;;  %v183_v29 = vld [vmem:[%s545_s1 + $0x20] sm:$0xff] }
  0x6b   :  { %v222_v45 = vmul.f32 %v206_v42, %v174_v39  ;;  %v196_v39 = vld [vmem:[#allocation5 + $0x8] sm:$0xff] }
  0x6d   :  { %v238_v53 = vadd.f32 %v222_v45, %v190_v50  ;;  %v195_v45 = vld [vmem:[#allocation5] sm:$0xff] }
  0x70   :  { %v133_v44 = vpop.permute.xlu2 %132 }
  0x71   :  { %v173_v46 = vmul.f32 %v472_v17, %v133_v44 }
  0x73   :  { %v221_v51 = vmul.f32 %v205_v48, %v173_v46  ;;  %v180_v46 = vld [vmem:[%s545_s1 + $0x8] sm:$0xff] }
  0x75   :  { %v237_v59 = vadd.f32 %v221_v51, %v189_v56  ;;  %v243_v51 = vld [vmem:[#allocation2] sm:$0xff] }
  0x78   :  { %v118_v62 = vpop.permute.xlu2 %117 }
  0x79   :  { %v170_v63 = vmul.f32 %v472_v17, %v118_v62 }
  0x7b   :  { %v218_v5 = vmul.f32 %v202_v2, %v170_v63 }
  0x7d   :  { %v234_v13 = vadd.f32 %v218_v5, %v186_v10 }
  0x7f   :  { %v158_v18 = vpop.permute.xlu0 %157 }
  0x80   :  { %v148_v19 = vpop.permute.xlu1 %147  ;;  %v178_v21 = vmul.f32 %v472_v17, %v158_v18  ;;  %v103_v16 = vpop.permute.xlu2 %102 }
  0x81   :  { %v176_v27 = vmul.f32 %v472_v17, %v148_v19  ;;  %v167_v18 = vmul.f32 %v472_v17, %v103_v16 }
  0x82   :  { %v226_v23 = vmul.f32 %v210_v20, %v178_v21  ;;  %v199_v21 = vld [vmem:[#allocation5 + $0x20] sm:$0xff] }
  0x83   :  { %v224_v34 = vmul.f32 %v208_v30, %v176_v27  ;;  %v198_v27 = vld [vmem:[#allocation5 + $0x18] sm:$0xff] }
  0x84   :  { %v242_v24 = vadd.f32 %v226_v23, %v194_v22  ;;  %v184_v23 = vld [vmem:[%s545_s1 + $0x28] sm:$0xff] }
  0x85   :  { %v240_v41 = vadd.f32 %v224_v34, %v192_v38  ;;  %v197_v34 = vld [vmem:[#allocation5 + $0x10] sm:$0xff] }
  0x86   :  { %245 = vmatpush.xpose.msra.mxu0 %v242_v24  ;;  %v215_v24 = vmul.f32 %v199_v21, %v167_v18 }
  0x87   :  { %v153_v26 = vpop.permute.xlu0 %152 }
  0x88   :  { %v177_v28 = vmul.f32 %v472_v17, %v153_v26  ;;  %v143_v31 = vpop.permute.xlu1 %142 }
  0x89   :  { %v175_v35 = vmul.f32 %v472_v17, %v143_v31 }
  0x8a   :  { %v225_v33 = vmul.f32 %v209_v25, %v177_v28 }
  0x8b   :  { %v223_v40 = vmul.f32 %v207_v37, %v175_v35  ;;  %v182_v35 = vld [vmem:[%s545_s1 + $0x18] sm:$0xff] }
  0x8c   :  { %v241_v36 = vadd.f32 %v225_v33, %v193_v32  ;;  %v231_v32 = vadd.f32 %v215_v24, %v183_v29  ;;  %v88_v33 = vpop.permute.xlu2 %87 }
  0x8d   :  { %v239_v47 = vadd.f32 %v223_v40, %v191_v43 }
  0x8e   :  { %246 = vmatpush.xpose.msra.mxu0 %v241_v36  ;;  %v164_v36 = vmul.f32 %v472_v17, %v88_v33 }
  0x8f   :  { %v128_v49 = vpop.permute.xlu0 %127 }
  0x90   :  { %v172_v52 = vmul.f32 %v472_v17, %v128_v49  ;;  %v123_v55 = vpop.permute.xlu1 %122  ;;  %v212_v42 = vmul.f32 %v196_v39, %v164_v36  ;;  %v179_v49 = vld [vmem:[%s545_s1] sm:$0xff] }
  0x91   :  { %v171_v58 = vmul.f32 %v472_v17, %v123_v55 }
  0x92   :  { %247 = vmatpush.xpose.msra.mxu0 %v240_v41  ;;  %v220_v57 = vmul.f32 %v204_v54, %v172_v52  ;;  %v181_v41 = vld [vmem:[%s545_s1 + $0x10] sm:$0xff]  ;;  %v228_v48 = vadd.f32 %v212_v42, %v180_v46 }
  0x93   :  { %v219_v0 = vmul.f32 %v203_v60, %v171_v58 }
  0x94   :  { %v236_v1 = vadd.f32 %v220_v57, %v188_v61 }
  0x95   :  { %v235_v7 = vadd.f32 %v219_v0, %v187_v4 }
  0x96   :  { %248 = vmatpush.xpose.msra.mxu0 %v239_v47 }
  0x97   :  { %v113_v3 = vpop.permute.xlu0 %112 }
  0x98   :  { %v169_v6 = vmul.f32 %v472_v17, %v113_v3  ;;  %v108_v9 = vpop.permute.xlu1 %107 }
  0x99   :  { %v168_v12 = vmul.f32 %v472_v17, %v108_v9 }
  0x9a   :  { %249 = vmatpush.xpose.msra.mxu0 %v238_v53  ;;  %v217_v11 = vmul.f32 %v201_v8, %v169_v6 }
  0x9b   :  { %v216_v19 = vmul.f32 %v200_v14, %v168_v12 }
  0x9c   :  { %v233_v20 = vadd.f32 %v217_v11, %v185_v15 }
  0x9d   :  { %v232_v26 = vadd.f32 %v216_v19, %v184_v23 }
  0x9e   :  { %250 = vmatpush.xpose.msra.mxu0 %v237_v59 }
  0x9f   :  { %v98_v22 = vpop.permute.xlu0 %97 }
  0xa0   :  { %v166_v25 = vmul.f32 %v472_v17, %v98_v22  ;;  %v93_v28 = vpop.permute.xlu1 %92 }
  0xa1   :  { %v165_v31 = vmul.f32 %v472_v17, %v93_v28 }
  0xa2   :  { %251 = vmatpush.xpose.msra.mxu0 %v236_v1  ;;  %v214_v30 = vmul.f32 %v198_v27, %v166_v25 }
  0xa3   :  { %v213_v37 = vmul.f32 %v197_v34, %v165_v31 }
  0xa4   :  { %v230_v38 = vadd.f32 %v214_v30, %v182_v35 }
  0xa5   :  { %v229_v44 = vadd.f32 %v213_v37, %v181_v41 }
  0xa6   :  { %252 = vmatpush.xpose.msra.mxu0 %v235_v7 }
  0xa7   :  { %v83_v40 = vpop.permute.xlu0 %82 }
  0xa8   :  { %v163_v43 = vmul.f32 %v472_v17, %v83_v40  ;;  %v295_v17 = vld [vmem:[%s549_s5] ss:$0 sm:$0xff] }
  0xaa   :  { %253 = vmatpush.xpose.msra.mxu0 %v234_v13  ;;  %v211_v47 = vmul.f32 %v195_v45, %v163_v43 }
  0xac   :  { %v227_v50 = vadd.f32 %v211_v47, %v179_v49 }
  0xae   :  { %254 = vmatpush.xpose.msra.mxu0 %v233_v20 }
  0xb2   :  { %255 = vmatpush.xpose.msra.mxu0 %v232_v26 }
  0xb6   :  { %256 = vmatpush.xpose.msra.mxu0 %v231_v32 }
  0xba   :  { %257 = vmatpush.xpose.msra.mxu0 %v230_v38 }
  0xbe   :  { %258 = vmatpush.xpose.msra.mxu0 %v229_v44 }
  0xc2   :  { %259 = vmatpush.xpose.msra.mxu0 %v228_v48 }
  0xc6   :  { %260 = vmatpush.xpose.msra.mxu0 %v227_v50 }
  0xc9   :  { %261 = vmatmul.f32.vlgmr.msra.gmra.mxu0 %v243_v51 }
 0x146   :  { %v262_v52 = vpop.f32.mrf.mxu0 }
 0x147   :  { %v265_v53 = vadd.f32 %v295_v17, %v262_v52 }
 0x149   :  { %266 = vst [vmem:[#allocation7] sm:$0xff] %v265_v53 }
 0x14a   :  { %277 = dma.vmem_to_hbm [thread:$0]  %s273_s20, 128, %s275_s23, [#allocation4]  }
 0x14b   :  { %372 = dma.done.wait [#allocation4], 128  }
 0x14c   :  { %373 = vsyncadd [#allocation4], 4294967168 }
 0x14d   :  { %282 = vsyncpa [#allocation3], 1 }
 0x14e   :  { %283 = vsyncpa [#allocation6], 1 }
 0x14f   :  { %284 = vsyncpa [#allocation4], 1 }

</bundles_post_ra>
